<compile_context>
chip_gen: v7x
topology: tpu7x:2x2x1
jax: 0.10.0
libtpu: 0.0.40
codegen_flags: <defaults>
</compile_context>

<pallas_src>
import functools

import jax
import jax.numpy as jnp
from jax.experimental import pallas as pl
from jax.experimental.pallas import tpu as pltpu


def _resblock_kernel(x_ref, w1_ref, b1_ref, w2_ref, b2_ref, o_ref,
                     *, H, W, Cin, Cmid):
    HW = H * W
    x = x_ref[0]                                      # (Cin, HW), input dtype
    x_f32 = x.astype(jnp.float32)
    relu_x = jnp.maximum(x, jnp.zeros_like(x))        # ReLU (exact in any float dtype)

    # Column index of each flattened spatial position (lane-wise iota).
    col = jax.lax.broadcasted_iota(jnp.int32, (1, HW), 1) % W

    def shifted(v, s):
        # a[:, p] = v[:, p + s] for 0 <= p + s < HW, else 0 (static lane shift).
        if s == 0:
            return v
        z = jnp.zeros((v.shape[0], abs(s)), v.dtype)
        if s > 0:
            return jnp.concatenate([v[:, s:], z], axis=1)
        return jnp.concatenate([z, v[:, :s]], axis=1)

    # im2col patch: row (dy*3 + dx)*Cin + c holds relu(x)[c] shifted by (dy-1, dx-1).
    taps = []
    for dy in range(3):
        for dx in range(3):
            sy, sx = dy - 1, dx - 1
            t = shifted(relu_x, sy * W + sx)
            if sx != 0:  # zero columns that wrapped across a row boundary
                valid = jnp.logical_and(col + sx >= 0, col + sx < W)
                t = jnp.where(valid, t, jnp.zeros_like(t))
            taps.append(t)
    patch = jnp.concatenate(taps, axis=0)             # (9*Cin, HW)

    # 3x3 conv as ONE matmul; spatial on the MXU N dim; f32 accumulation.
    h = jnp.dot(w1_ref[...], patch, preferred_element_type=jnp.float32)
    h = jnp.maximum(h + b1_ref[...].astype(jnp.float32), 0.0)     # (Cmid, HW)

    # 1x1 conv as a second single matmul.
    out = jnp.dot(w2_ref[...], h.astype(w2_ref.dtype),
                  preferred_element_type=jnp.float32)             # (Cin, HW)
    out = out + b2_ref[...].astype(jnp.float32) + x_f32           # residual (pre-ReLU x)

    o_ref[0] = out.astype(o_ref.dtype)


def _resblock_forward_flat(x_flat, w1, b1, w2, b2, *, H, W):
    """x_flat: (N, Cin, H*W); w1: (Cmid, 9*Cin); w2: (Cin, Cmid)."""
    N, Cin, HW = x_flat.shape
    Cmid = w1.shape[0]
    kernel = functools.partial(_resblock_kernel, H=H, W=W, Cin=Cin, Cmid=Cmid)
    return pl.pallas_call(
        kernel,
        out_shape=jax.ShapeDtypeStruct((N, Cin, HW), x_flat.dtype),
        grid_spec=pltpu.PrefetchScalarGridSpec(
            num_scalar_prefetch=0,
            grid=(N,),
            in_specs=[
                pl.BlockSpec((1, Cin, HW), lambda n: (n, 0, 0)),
                pl.BlockSpec((Cmid, 9 * Cin), lambda n: (0, 0)),
                pl.BlockSpec((Cmid, 1), lambda n: (0, 0)),
                pl.BlockSpec((Cin, Cmid), lambda n: (0, 0)),
                pl.BlockSpec((Cin, 1), lambda n: (0, 0)),
            ],
            out_specs=pl.BlockSpec((1, Cin, HW), lambda n: (n, 0, 0)),
        ),
        compiler_params=pltpu.CompilerParams(
            dimension_semantics=("parallel",)),
    )(x_flat, w1, b1, w2, b2)


def resblock_forward_nchw(x_nchw, conv1_w, conv1_b, conv2_w, conv2_b):
    """PyTorch-convention entry point (no NCHW<->NHWC transposes needed).

    x_nchw:  (N, Cin, H, W)
    conv1_w: (Cmid, Cin, 3, 3)   conv1_b: (Cmid,)
    conv2_w: (Cin, Cmid, 1, 1)   conv2_b: (Cin,)
    """
    N, Cin, H, W = x_nchw.shape
    Cmid = conv1_w.shape[0]
    # (Cmid, Cin, 3, 3) -> (Cmid, 3, 3, Cin) -> (Cmid, 9*Cin); column k*Cin+c, k=dy*3+dx.
    w1 = jnp.transpose(conv1_w, (0, 2, 3, 1)).reshape(Cmid, 9 * Cin)
    w1 = w1.astype(x_nchw.dtype)
    b1 = conv1_b.reshape(Cmid, 1)
    w2 = conv2_w[:, :, 0, 0].astype(x_nchw.dtype)       # (Cin, Cmid)
    b2 = conv2_b.reshape(Cin, 1)

    x_flat = x_nchw.reshape(N, Cin, H * W)              # free contiguous reshape
    out_flat = _resblock_forward_flat(x_flat, w1, b1, w2, b2, H=H, W=W)
    return out_flat.reshape(N, Cin, H, W)


def resblock_reference_nchw(x, conv1_w, conv1_b, conv2_w, conv2_b):
    """Pure-JAX reference matching the PyTorch ResBlock forward exactly."""
    h = jax.nn.relu(x)
    h = jax.lax.conv_general_dilated(
        h, conv1_w, window_strides=(1, 1), padding="SAME",
        dimension_numbers=("NCHW", "OIHW", "NCHW"))
    h = h + conv1_b[None, :, None, None]
    h = jax.nn.relu(h)
    h = jax.lax.conv_general_dilated(
        h, conv2_w, window_strides=(1, 1), padding="VALID",
        dimension_numbers=("NCHW", "OIHW", "NCHW"))
    h = h + conv2_b[None, :, None, None]
    return h + x


if __name__ == "__main__":
    # Small shapes consistent with ResBlock(in_channel=4, channel=8).
    N, Cin, Cmid, H, W = 2, 4, 8, 16, 16

    key = jax.random.PRNGKey(0)
    kx, k1, k2, k3, k4 = jax.random.split(key, 5)

    x = jax.random.normal(kx, (N, Cin, H, W), jnp.float32)
    conv1_w = 0.1 * jax.random.normal(k1, (Cmid, Cin, 3, 3), jnp.float32)
    conv1_b = 0.1 * jax.random.normal(k2, (Cmid,), jnp.float32)
    conv2_w = 0.1 * jax.random.normal(k3, (Cin, Cmid, 1, 1), jnp.float32)
    conv2_b = 0.1 * jax.random.normal(k4, (Cin,), jnp.float32)

    out = resblock_forward_nchw(x, conv1_w, conv1_b, conv2_w, conv2_b)
    out = jax.block_until_ready(out)

    ref = resblock_reference_nchw(x, conv1_w, conv1_b, conv2_w, conv2_b)
    ref = jax.block_until_ready(ref)

    assert out.shape == (N, Cin, H, W)
    assert jnp.allclose(out, ref, rtol=1e-4, atol=1e-4), (
        f"max abs err = {jnp.max(jnp.abs(out - ref))}")

    print("KERNEL_OK")
</pallas_src>

<mosaic_0001>
module attributes {stable_mosaic.version = 11 : i64} {
  func.func @_resblock_kernel(%arg0: i32, %arg1: memref<1x4x256xf32, #tpu.memory_space<vmem>>, %arg2: memref<8x36xf32, #tpu.memory_space<vmem>>, %arg3: memref<8x1xf32, #tpu.memory_space<vmem>>, %arg4: memref<4x8xf32, #tpu.memory_space<vmem>>, %arg5: memref<4x1xf32, #tpu.memory_space<vmem>>, %arg6: memref<1x4x256xf32, #tpu.memory_space<vmem>>) attributes {dimension_semantics = [#tpu.dimension_semantics<parallel>], iteration_bounds = array<i64: 2>, scalar_prefetch = 0 : i64, scratch_operands = 0 : i64, tpu.core_type = #tpu.core_type<tc>, window_params = [{transform_indices = @transform_0, window_bounds = array<i64: 1, 4, 256>}, {pipeline_mode = #tpu.pipeline_mode<synchronous>, transform_indices = @transform_1, window_bounds = array<i64: 8, 36>}, {pipeline_mode = #tpu.pipeline_mode<synchronous>, transform_indices = @transform_2, window_bounds = array<i64: 8, 1>}, {pipeline_mode = #tpu.pipeline_mode<synchronous>, transform_indices = @transform_3, window_bounds = array<i64: 4, 8>}, {pipeline_mode = #tpu.pipeline_mode<synchronous>, transform_indices = @transform_4, window_bounds = array<i64: 4, 1>}, {transform_indices = @transform_5, window_bounds = array<i64: 1, 4, 256>}]} {
    %c0 = arith.constant 0 : index
    %c0_0 = arith.constant 0 : index
    %c0_1 = arith.constant 0 : index
    %0 = vector.load %arg1[%c0, %c0_0, %c0_1] : memref<1x4x256xf32, #tpu.memory_space<vmem>>, vector<1x4x256xf32>
    %1 = vector.shape_cast %0 : vector<1x4x256xf32> to vector<4x256xf32>
    %cst = arith.constant 0.000000e+00 : f32
    %2 = vector.broadcast %cst : f32 to vector<4x256xf32>
    %3 = arith.maximumf %1, %2 : vector<4x256xf32>
    %4 = tpu.iota {dimensions = array<i32: 1>} : vector<1x256xi32>
    %c16_i32 = arith.constant 16 : i32
    %c0_i32 = arith.constant 0 : i32
    %5 = arith.cmpi eq, %c16_i32, %c0_i32 : i32
    %c1_i32 = arith.constant 1 : i32
    %6 = arith.select %5, %c1_i32, %c16_i32 : i32
    %7 = vector.broadcast %6 : i32 to vector<1x256xi32>
    %8 = arith.remsi %4, %7 : vector<1x256xi32>
    %c0_i32_2 = arith.constant 0 : i32
    %9 = vector.broadcast %c0_i32_2 : i32 to vector<1x256xi32>
    %10 = arith.cmpi ne, %8, %9 : vector<1x256xi32>
    %c0_i32_3 = arith.constant 0 : i32
    %11 = vector.broadcast %c0_i32_3 : i32 to vector<1x256xi32>
    %12 = arith.cmpi slt, %8, %11 : vector<1x256xi32>
    %c0_i32_4 = arith.constant 0 : i32
    %13 = arith.cmpi slt, %6, %c0_i32_4 : i32
    %14 = vector.broadcast %13 : i1 to vector<1x256xi1>
    %15 = vector.broadcast %14 : vector<1x256xi1> to vector<1x256xi1>
    %16 = arith.xori %12, %15 : vector<1x256xi1>
    %17 = arith.andi %16, %10 : vector<1x256xi1>
    %18 = vector.broadcast %6 : i32 to vector<1x256xi32>
    %19 = arith.addi %8, %18 : vector<1x256xi32>
    %20 = arith.select %17, %19, %8 : vector<1x256xi1>, vector<1x256xi32>
    %cst_5 = arith.constant 0.000000e+00 : f32
    %21 = vector.broadcast %cst_5 : f32 to vector<4x17xf32>
    %22 = vector.extract_strided_slice %3 {offsets = [0, 0], sizes = [4, 239], strides = [1, 1]} : vector<4x256xf32> to vector<4x239xf32>
    %23 = tpu.concatenate %21, %22 in 1 : vector<4x17xf32>, vector<4x239xf32> -> vector<4x256xf32>
    %c-1_i32 = arith.constant -1 : i32
    %24 = vector.broadcast %c-1_i32 : i32 to vector<1x256xi32>
    %25 = arith.addi %20, %24 : vector<1x256xi32>
    %c0_i32_6 = arith.constant 0 : i32
    %26 = vector.broadcast %c0_i32_6 : i32 to vector<1x256xi32>
    %27 = arith.cmpi sge, %25, %26 : vector<1x256xi32>
    %c-1_i32_7 = arith.constant -1 : i32
    %28 = vector.broadcast %c-1_i32_7 : i32 to vector<1x256xi32>
    %29 = arith.addi %20, %28 : vector<1x256xi32>
    %c16_i32_8 = arith.constant 16 : i32
    %30 = vector.broadcast %c16_i32_8 : i32 to vector<1x256xi32>
    %31 = arith.cmpi slt, %29, %30 : vector<1x256xi32>
    %32 = arith.andi %27, %31 : vector<1x256xi1>
    %cst_9 = arith.constant 0.000000e+00 : f32
    %33 = vector.broadcast %cst_9 : f32 to vector<4x256xf32>
    %34 = vector.shape_cast %32 : vector<1x256xi1> to vector<1x256xi1>
    %35 = vector.broadcast %34 : vector<1x256xi1> to vector<4x256xi1>
    %36 = arith.select %35, %23, %33 : vector<4x256xi1>, vector<4x256xf32>
    %cst_10 = arith.constant 0.000000e+00 : f32
    %37 = vector.broadcast %cst_10 : f32 to vector<4x16xf32>
    %38 = vector.extract_strided_slice %3 {offsets = [0, 0], sizes = [4, 240], strides = [1, 1]} : vector<4x256xf32> to vector<4x240xf32>
    %39 = tpu.concatenate %37, %38 in 1 : vector<4x16xf32>, vector<4x240xf32> -> vector<4x256xf32>
    %cst_11 = arith.constant 0.000000e+00 : f32
    %40 = vector.broadcast %cst_11 : f32 to vector<4x15xf32>
    %41 = vector.extract_strided_slice %3 {offsets = [0, 0], sizes = [4, 241], strides = [1, 1]} : vector<4x256xf32> to vector<4x241xf32>
    %42 = tpu.concatenate %40, %41 in 1 : vector<4x15xf32>, vector<4x241xf32> -> vector<4x256xf32>
    %c1_i32_12 = arith.constant 1 : i32
    %43 = vector.broadcast %c1_i32_12 : i32 to vector<1x256xi32>
    %44 = arith.addi %20, %43 : vector<1x256xi32>
    %c0_i32_13 = arith.constant 0 : i32
    %45 = vector.broadcast %c0_i32_13 : i32 to vector<1x256xi32>
    %46 = arith.cmpi sge, %44, %45 : vector<1x256xi32>
    %c1_i32_14 = arith.constant 1 : i32
    %47 = vector.broadcast %c1_i32_14 : i32 to vector<1x256xi32>
    %48 = arith.addi %20, %47 : vector<1x256xi32>
    %c16_i32_15 = arith.constant 16 : i32
    %49 = vector.broadcast %c16_i32_15 : i32 to vector<1x256xi32>
    %50 = arith.cmpi slt, %48, %49 : vector<1x256xi32>
    %51 = arith.andi %46, %50 : vector<1x256xi1>
    %cst_16 = arith.constant 0.000000e+00 : f32
    %52 = vector.broadcast %cst_16 : f32 to vector<4x256xf32>
    %53 = vector.shape_cast %51 : vector<1x256xi1> to vector<1x256xi1>
    %54 = vector.broadcast %53 : vector<1x256xi1> to vector<4x256xi1>
    %55 = arith.select %54, %42, %52 : vector<4x256xi1>, vector<4x256xf32>
    %cst_17 = arith.constant 0.000000e+00 : f32
    %56 = vector.broadcast %cst_17 : f32 to vector<4x1xf32>
    %57 = vector.extract_strided_slice %3 {offsets = [0, 0], sizes = [4, 255], strides = [1, 1]} : vector<4x256xf32> to vector<4x255xf32>
    %58 = tpu.concatenate %56, %57 in 1 : vector<4x1xf32>, vector<4x255xf32> -> vector<4x256xf32>
    %c-1_i32_18 = arith.constant -1 : i32
    %59 = vector.broadcast %c-1_i32_18 : i32 to vector<1x256xi32>
    %60 = arith.addi %20, %59 : vector<1x256xi32>
    %c0_i32_19 = arith.constant 0 : i32
    %61 = vector.broadcast %c0_i32_19 : i32 to vector<1x256xi32>
    %62 = arith.cmpi sge, %60, %61 : vector<1x256xi32>
    %c-1_i32_20 = arith.constant -1 : i32
    %63 = vector.broadcast %c-1_i32_20 : i32 to vector<1x256xi32>
    %64 = arith.addi %20, %63 : vector<1x256xi32>
    %c16_i32_21 = arith.constant 16 : i32
    %65 = vector.broadcast %c16_i32_21 : i32 to vector<1x256xi32>
    %66 = arith.cmpi slt, %64, %65 : vector<1x256xi32>
    %67 = arith.andi %62, %66 : vector<1x256xi1>
    %cst_22 = arith.constant 0.000000e+00 : f32
    %68 = vector.broadcast %cst_22 : f32 to vector<4x256xf32>
    %69 = vector.shape_cast %67 : vector<1x256xi1> to vector<1x256xi1>
    %70 = vector.broadcast %69 : vector<1x256xi1> to vector<4x256xi1>
    %71 = arith.select %70, %58, %68 : vector<4x256xi1>, vector<4x256xf32>
    %cst_23 = arith.constant 0.000000e+00 : f32
    %72 = vector.broadcast %cst_23 : f32 to vector<4x1xf32>
    %73 = vector.extract_strided_slice %3 {offsets = [0, 1], sizes = [4, 255], strides = [1, 1]} : vector<4x256xf32> to vector<4x255xf32>
    %74 = tpu.concatenate %73, %72 in 1 : vector<4x255xf32>, vector<4x1xf32> -> vector<4x256xf32>
    %c1_i32_24 = arith.constant 1 : i32
    %75 = vector.broadcast %c1_i32_24 : i32 to vector<1x256xi32>
    %76 = arith.addi %20, %75 : vector<1x256xi32>
    %c0_i32_25 = arith.constant 0 : i32
    %77 = vector.broadcast %c0_i32_25 : i32 to vector<1x256xi32>
    %78 = arith.cmpi sge, %76, %77 : vector<1x256xi32>
    %c1_i32_26 = arith.constant 1 : i32
    %79 = vector.broadcast %c1_i32_26 : i32 to vector<1x256xi32>
    %80 = arith.addi %20, %79 : vector<1x256xi32>
    %c16_i32_27 = arith.constant 16 : i32
    %81 = vector.broadcast %c16_i32_27 : i32 to vector<1x256xi32>
    %82 = arith.cmpi slt, %80, %81 : vector<1x256xi32>
    %83 = arith.andi %78, %82 : vector<1x256xi1>
    %cst_28 = arith.constant 0.000000e+00 : f32
    %84 = vector.broadcast %cst_28 : f32 to vector<4x256xf32>
    %85 = vector.shape_cast %83 : vector<1x256xi1> to vector<1x256xi1>
    %86 = vector.broadcast %85 : vector<1x256xi1> to vector<4x256xi1>
    %87 = arith.select %86, %74, %84 : vector<4x256xi1>, vector<4x256xf32>
    %cst_29 = arith.constant 0.000000e+00 : f32
    %88 = vector.broadcast %cst_29 : f32 to vector<4x15xf32>
    %89 = vector.extract_strided_slice %3 {offsets = [0, 15], sizes = [4, 241], strides = [1, 1]} : vector<4x256xf32> to vector<4x241xf32>
    %90 = tpu.concatenate %89, %88 in 1 : vector<4x241xf32>, vector<4x15xf32> -> vector<4x256xf32>
    %c-1_i32_30 = arith.constant -1 : i32
    %91 = vector.broadcast %c-1_i32_30 : i32 to vector<1x256xi32>
    %92 = arith.addi %20, %91 : vector<1x256xi32>
    %c0_i32_31 = arith.constant 0 : i32
    %93 = vector.broadcast %c0_i32_31 : i32 to vector<1x256xi32>
    %94 = arith.cmpi sge, %92, %93 : vector<1x256xi32>
    %c-1_i32_32 = arith.constant -1 : i32
    %95 = vector.broadcast %c-1_i32_32 : i32 to vector<1x256xi32>
    %96 = arith.addi %20, %95 : vector<1x256xi32>
    %c16_i32_33 = arith.constant 16 : i32
    %97 = vector.broadcast %c16_i32_33 : i32 to vector<1x256xi32>
    %98 = arith.cmpi slt, %96, %97 : vector<1x256xi32>
    %99 = arith.andi %94, %98 : vector<1x256xi1>
    %cst_34 = arith.constant 0.000000e+00 : f32
    %100 = vector.broadcast %cst_34 : f32 to vector<4x256xf32>
    %101 = vector.shape_cast %99 : vector<1x256xi1> to vector<1x256xi1>
    %102 = vector.broadcast %101 : vector<1x256xi1> to vector<4x256xi1>
    %103 = arith.select %102, %90, %100 : vector<4x256xi1>, vector<4x256xf32>
    %cst_35 = arith.constant 0.000000e+00 : f32
    %104 = vector.broadcast %cst_35 : f32 to vector<4x16xf32>
    %105 = vector.extract_strided_slice %3 {offsets = [0, 16], sizes = [4, 240], strides = [1, 1]} : vector<4x256xf32> to vector<4x240xf32>
    %106 = tpu.concatenate %105, %104 in 1 : vector<4x240xf32>, vector<4x16xf32> -> vector<4x256xf32>
    %cst_36 = arith.constant 0.000000e+00 : f32
    %107 = vector.broadcast %cst_36 : f32 to vector<4x17xf32>
    %108 = vector.extract_strided_slice %3 {offsets = [0, 17], sizes = [4, 239], strides = [1, 1]} : vector<4x256xf32> to vector<4x239xf32>
    %109 = tpu.concatenate %108, %107 in 1 : vector<4x239xf32>, vector<4x17xf32> -> vector<4x256xf32>
    %c1_i32_37 = arith.constant 1 : i32
    %110 = vector.broadcast %c1_i32_37 : i32 to vector<1x256xi32>
    %111 = arith.addi %20, %110 : vector<1x256xi32>
    %c0_i32_38 = arith.constant 0 : i32
    %112 = vector.broadcast %c0_i32_38 : i32 to vector<1x256xi32>
    %113 = arith.cmpi sge, %111, %112 : vector<1x256xi32>
    %c1_i32_39 = arith.constant 1 : i32
    %114 = vector.broadcast %c1_i32_39 : i32 to vector<1x256xi32>
    %115 = arith.addi %20, %114 : vector<1x256xi32>
    %c16_i32_40 = arith.constant 16 : i32
    %116 = vector.broadcast %c16_i32_40 : i32 to vector<1x256xi32>
    %117 = arith.cmpi slt, %115, %116 : vector<1x256xi32>
    %118 = arith.andi %113, %117 : vector<1x256xi1>
    %cst_41 = arith.constant 0.000000e+00 : f32
    %119 = vector.broadcast %cst_41 : f32 to vector<4x256xf32>
    %120 = vector.shape_cast %118 : vector<1x256xi1> to vector<1x256xi1>
    %121 = vector.broadcast %120 : vector<1x256xi1> to vector<4x256xi1>
    %122 = arith.select %121, %109, %119 : vector<4x256xi1>, vector<4x256xf32>
    %123 = tpu.concatenate %36, %39, %55, %71, %3, %87, %103, %106, %122 in 0 : vector<4x256xf32>, vector<4x256xf32>, vector<4x256xf32>, vector<4x256xf32>, vector<4x256xf32>, vector<4x256xf32>, vector<4x256xf32>, vector<4x256xf32>, vector<4x256xf32> -> vector<36x256xf32>
    %c0_42 = arith.constant 0 : index
    %c0_43 = arith.constant 0 : index
    %124 = vector.load %arg2[%c0_42, %c0_43] : memref<8x36xf32, #tpu.memory_space<vmem>>, vector<8x36xf32>
    %cst_44 = arith.constant dense<0.000000e+00> : vector<8x256xf32>
    %125 = tpu.matmul %124, %123, %cst_44 {dimension_numbers = #tpu.dot_dimension_numbers<[1], [0], [0], [1], [0, 0, 1, 1], [], []>} : vector<8x36xf32>, vector<36x256xf32>, vector<8x256xf32> -> vector<8x256xf32>
    %c0_45 = arith.constant 0 : index
    %c0_46 = arith.constant 0 : index
    %126 = vector.load %arg3[%c0_45, %c0_46] : memref<8x1xf32, #tpu.memory_space<vmem>>, vector<8x1xf32>
    %127 = vector.broadcast %126 : vector<8x1xf32> to vector<8x256xf32>
    %128 = arith.addf %125, %127 : vector<8x256xf32>
    %cst_47 = arith.constant 0.000000e+00 : f32
    %129 = vector.broadcast %cst_47 : f32 to vector<8x256xf32>
    %130 = arith.maximumf %128, %129 : vector<8x256xf32>
    %c0_48 = arith.constant 0 : index
    %c0_49 = arith.constant 0 : index
    %131 = vector.load %arg4[%c0_48, %c0_49] : memref<4x8xf32, #tpu.memory_space<vmem>>, vector<4x8xf32>
    %cst_50 = arith.constant dense<0.000000e+00> : vector<4x256xf32>
    %132 = tpu.matmul %131, %130, %cst_50 {dimension_numbers = #tpu.dot_dimension_numbers<[1], [0], [0], [1], [0, 0, 1, 1], [], []>} : vector<4x8xf32>, vector<8x256xf32>, vector<4x256xf32> -> vector<4x256xf32>
    %c0_51 = arith.constant 0 : index
    %c0_52 = arith.constant 0 : index
    %133 = vector.load %arg5[%c0_51, %c0_52] : memref<4x1xf32, #tpu.memory_space<vmem>>, vector<4x1xf32>
    %134 = vector.broadcast %133 : vector<4x1xf32> to vector<4x256xf32>
    %135 = arith.addf %132, %134 : vector<4x256xf32>
    %136 = arith.addf %135, %1 : vector<4x256xf32>
    %c0_53 = arith.constant 0 : index
    %c0_54 = arith.constant 0 : index
    %c0_55 = arith.constant 0 : index
    %137 = vector.load %arg6[%c0_53, %c0_54, %c0_55] : memref<1x4x256xf32, #tpu.memory_space<vmem>>, vector<1x4x256xf32>
    %138 = vector.shape_cast %137 : vector<1x4x256xf32> to vector<4x256xf32>
    %139 = vector.shape_cast %136 : vector<4x256xf32> to vector<1x4x256xf32>
    tpu.vector_store %arg6[%c0_53, %c0_54, %c0_55], %139 {strides = array<i32>} : memref<1x4x256xf32, #tpu.memory_space<vmem>>, vector<1x4x256xf32>,
    return
  }
  func.func @transform_0(%arg0: i32) -> (i32, i32, i32) {
    %c0_i32 = arith.constant 0 : i32
    %c0_i32_0 = arith.constant 0 : i32
    %c0_i32_1 = arith.constant 0 : i32
    return %arg0, %c0_i32, %c0_i32_0 : i32, i32, i32
  }
  func.func @transform_1(%arg0: i32) -> (i32, i32) {
    %c0_i32 = arith.constant 0 : i32
    %c0_i32_0 = arith.constant 0 : i32
    %c0_i32_1 = arith.constant 0 : i32
    return %c0_i32, %c0_i32_0 : i32, i32
  }
  func.func @transform_2(%arg0: i32) -> (i32, i32) {
    %c0_i32 = arith.constant 0 : i32
    %c0_i32_0 = arith.constant 0 : i32
    %c0_i32_1 = arith.constant 0 : i32
    return %c0_i32, %c0_i32_0 : i32, i32
  }
  func.func @transform_3(%arg0: i32) -> (i32, i32) {
    %c0_i32 = arith.constant 0 : i32
    %c0_i32_0 = arith.constant 0 : i32
    %c0_i32_1 = arith.constant 0 : i32
    return %c0_i32, %c0_i32_0 : i32, i32
  }
  func.func @transform_4(%arg0: i32) -> (i32, i32) {
    %c0_i32 = arith.constant 0 : i32
    %c0_i32_0 = arith.constant 0 : i32
    %c0_i32_1 = arith.constant 0 : i32
    return %c0_i32, %c0_i32_0 : i32, i32
  }
  func.func @transform_5(%arg0: i32) -> (i32, i32, i32) {
    %c0_i32 = arith.constant 0 : i32
    %c0_i32_0 = arith.constant 0 : i32
    %c0_i32_1 = arith.constant 0 : i32
    return %arg0, %c0_i32, %c0_i32_0 : i32, i32, i32
  }
}

</mosaic_0001>

<bundles_post_ra>
// kernel: tpu_custom_call.1
= control target key start
LH: loop header
LB: loop body
LE: loop exit
PB: predicated region body
PF: predicated region fallthrough
CT: control target
= control target key end

     0   :  { %10 = vsyncpa [#allocation3], 0  ;;  %s1196_s0 = inlined_call_operand.hbm [shape: f32[2,4,256], index: 0, kind: input, shape index: {}]   ;;  %s1197_s1 = inlined_call_operand.vmem [shape: f32[8,36], index: 1, kind: input, shape index: {}]   ;;  %s1198_s2 = inlined_call_operand.vmem [shape: f32[8,1], index: 2, kind: input, shape index: {}]   ;;  %s1199_s3 = inlined_call_operand.vmem [shape: f32[4,8], index: 3, kind: input, shape index: {}]   ;;  %s1200_s4 = inlined_call_operand.vmem [shape: f32[4,1], index: 4, kind: input, shape index: {}]   ;;  %s1201_s5 = inlined_call_operand.hbm [shape: f32[2,4,256], index: 5, kind: output, shape index: {}]  }
   0x1   :  { %12 = vsyncpa [#allocation3 + $0x1], 0 }
   0x2   :  { %13 = vsyncpa [#allocation4], 0 }
   0x3   :  { %15 = vsyncpa [#allocation4 + $0x1], 0  ;;  %s939_s18 = smov 0   ;;  %s941_s19 = smov 0  }
   0x4   :  { %s943_s20 = smov 0   ;;  %s945_s21 = smov 0  }
   0x5 LB: > { %s960_s22 = sadd.s32 4294967295, %s895_s21   ;;  %s677_s23 = sadd.s32 4294967294, %s895_s21   ;;  %s895_s21 = sphi %s945_s21, %s1216_s21   ;;  %s891_s20 = sphi %s943_s20, %s1215_s20   ;;  %s887_s19 = sphi %s941_s19, %s1214_s19   ;;  %s883_s18 = sphi %s939_s18, %s1213_s18  }
   0x6   : > { %s964_s24 = sadd.s32 1, %s895_s21   ;;  %s28_s25 = sadd.s32 1, %s891_s20 }
   0x7   : > { %s25_s26 = ssub.s32 %s895_s21, %s964_s24  ;;  %p35_p0 = scmp.ne.s32.totalorder %s891_s20, %s887_s19 }
   0x8   : > { %p26_p1 = scmp.eq.s32.totalorder %s25_s26, 0  ;;  %p36_p2 = scmp.eq.s32.totalorder %s895_s21, 0 }
   0x9   : > { %p41_p3 = scmp.ne.s32.totalorder %s887_s19, %s883_s18  ;;  %p42_p4 = scmp.eq.s32.totalorder %s960_s22, 0 }
   0xa   : > { %s976_s27 = scalar_select %p26_p1, %s891_s20, %s28_s25  }
   0xb   : > { %p978_p5 = por %p36_p2, %p35_p0  ;;  %p982_p6 = por %p42_p4, %p41_p3 }
   0xc   : > { %p149_p7 = scmp.eq.s32.totalorder %s960_s22, 1  ;;  %p155_p8 = scmp.eq.s32.totalorder %s677_s23, 1 }
   0xd   : > { %p717_p10 = scmp.lt.s32.totalorder %s895_s21, 2  ;;  %s187_s7 = sand.u32 1, %s891_s20  }
   0xe   : > { %p989_p11 = por %p149_p7, %p35_p0  ;;  %p993_p12 = por %p155_p8, %p41_p3 }
   0xf   : > { %s695_s8 = sshll.u32 %s895_s21, 7  ;;  %s680_s9 = sshll.u32 %s187_s7, 3 }
  0x10   : > { %s1205_s30 = scalar_select %p989_p11, 1, 0 }
  0x11   : > { %s1206_s6 = scalar_select %p993_p12, 1, 0 }
  0x12   : > { %s1002_s12 = scalar_lea.hbm %s1196_s0, %s695_s8  ;;  %s191_s13 = scalar_lea.vmem [#allocation2], %s680_s9 }
  0x13   : > { %s199_s14 = sshll.u32 %s191_s13, 4  ;;  %p1006_p13 = pnand %p717_p10, %p978_p5  ;;  %s1010_s14 = int_to_ptr.vmem [resolvable:$true] %s199_s14 }
  0x14   : > { %s188_s16 = scalar_lea.sflag [#allocation3], %s187_s7  ;;  %s799_s17 = scalar_lea.hbm %s1002_s12, 128 }
  0x15   : > { %p800_p2 = scmp.ne.s32.totalorder %s1002_s12, %s799_s17  ;;  %p801_p3 = pneg %p1006_p13 }
  0x16   : > { %s804_s26 = scalar_lea.hbm %s1196_s0, 256  ;;  %p805_p5 = scmp.lt.u32.totalorder %s1002_s12, %s1196_s0 }
  0x17   : > { %p802_p4 = pnand %p801_p3, %p800_p2  ;;  %p806_p8 = scmp.lt.u32.totalorder %s804_s26, %s799_s17 }
  0x18   : > { %p808_p9 = scmp.lt.u32.totalorder %s799_s17, %s1002_s12 }
  0x19   : > { %p803_p7 = pneg %p802_p4  ;;  %p807_p10 = por %p806_p8, %p805_p5 }
  0x1b   : > { %p809_p0 = por %p808_p9, %p807_p10 }
  0x1d   : > { %p810_p1 = pnand %p809_p0, %p803_p7 }
  0x1f   : > { %813 = shalt.err (!%p810_p1)
}
  0x20   : > { %s814_s7 = scalar_lea.vmem %s1010_s14, 128  ;;  %s897_s9 = smov [#allocation2]  }
  0x21   : > { %p815_p2 = scmp.ne.s32.totalorder %s1010_s14, %s814_s7  ;;  %s819_s10 = sshll.u32 %s897_s9, 4  ;;  %s820_s10 = int_to_ptr.vmem [resolvable:$false] %s819_s10 }
  0x22   : > { %s821_s11 = scalar_lea.vmem %s820_s10, 256  ;;  %p822_p11 = scmp.lt.s32.totalorder %s1010_s14, %s820_s10 }
  0x23   : > { %p817_p4 = pnand %p815_p2, %p801_p3  ;;  %p823_p5 = scmp.lt.s32.totalorder %s821_s11, %s814_s7 }
  0x25   : > { %p818_p12 = pneg %p817_p4  ;;  %p824_p8 = por %p823_p5, %p822_p11 }
  0x27   : > { %p825_p9 = pnand %p824_p8, %p818_p12 }
  0x29   : > { %828 = shalt.err (!%p825_p9)
}
  0x2a   : > { %712 = dma.hbm_to_vmem [thread:$0]  (!%p1006_p13), %s1002_s12, 128, %s1010_s14, %s188_s16  }
  0x2b   : > { %p1208_p0 = scmp.lt.s32.totalorder %s895_s21, 3  ;;  %p1209_p1 = scmp.ge.s32.totalorder %s895_s21, 1 }
  0x2d   : > { %p205_p3 = pnand %p1209_p1, %p1208_p0 }
  0x2e   : > { %s1044_s13 = sand.u32 (!%p205_p3), 1, %s887_s19  }
  0x2f   : > { %208 = sbr.rel (%p205_p3) target bundleno = 654 (0x28e), region = 40  ;;  %s684_s17 = sshll.u32 (!%p205_p3), %s1044_s13, 3 }
  0x30   : > { %s211_s23 = scalar_lea.sflag (!%p205_p3), [#allocation3], %s1044_s13  ;;  %s214_s15 = scalar_lea.vmem (!%p205_p3), [#allocation2], %s684_s17 }
  0x36   : > { %874 = dma.done.wait (%p982_p6), %s211_s23, 128  }
  0x37   : > { %876 = vsyncadd (%p982_p6), %s211_s23, 4294967168  ;;  %v1054_v0 = vld [vmem:[%s214_s15] sm:$0xff]  ;;  %s898_s12 = smov 17   ;;  %s899_s14 = smov 1   ;;  %v906_v5 = vmov 0.0   ;;  %v907_v7 = vmov 0   ;;  %v243_v8 = vlaneseq }
  0x38   : > { %v1057_v1 = vmax.f32 %v1054_v0, 0.0  ;;  %s900_s16 = smov 15   ;;  %s901_s29 = smov 16   ;;  %491 = vmatprep.mubr.f32.mxu0 %v906_v5  ;;  %v411_v6 = vld [vmem:[%s1198_s2] sm:$0xff]  ;;  %575 = vmatprep.mubr.f32.mxu1 %v906_v5  ;;  %vm276_vm0 = vcmask 138240   ;;  %vm330_vm2 = vcmask 7168  }
  0x39   : > { %s902_s25 = smov 127   ;;  %s903_s26 = smov 112   ;;  %796 = vset.pattern.permute.xlu1 %v907_v7  ;;  %797 = vset.pattern.permute.xlu0 %v907_v7  ;;  %v244_v9 = vand.u32 127, %v243_v8  ;;  %vm307_vm4 = vcmask 121856   ;;  %vm299_vm5 = vcmask 130048   ;;  %vm341_vm7 = vcmask 1039360  }
  0x3a   : > { %v1061_v2 = vcombine.high %v1057_v1, %v1057_v1  ;;  %s904_s28 = smov 113   ;;  %s905_s8 = smov 111   ;;  %vm401_vm8 = vcmask 1043456   ;;  %vm363_vm9 = vcmask 916480   ;;  %vm352_vm11 = vcmask 924672  }
  0x3b   : > { %v245_v10 = vadd.s32 128, %v244_v9  ;;  %v250_v11 = vand.u32 15, %v244_v9  ;;  %vm371_vm12 = vcmask 908288   ;;  %vm417_vm13 = vcmask 293888   ;;  %s593_s7 = scalar_lea.sflag [#allocation4], %s1044_s13  ;;  %p1210_p11 = scmp.ne.s32.totalorder %s1205_s30, 0 }
  0x3c   : > { %v771_v3 = vpack.i.bf16 %v1061_v2, %v1057_v1  ;;  %v781_v4 = vpack.i.bf16 %v1057_v1, %v1061_v2  ;;  %vm507_vm14 = vcmask 64512  }
  0x3d   : > { %v257_v12 = vand.u32 15, %v245_v10  ;;  %v1072_v13 = vadd.s32 4294967295, %v250_v11  ;;  %v1080_v18 = vadd.s32 1, %v250_v11 }
  0x3e   : > { %772 = vrot.lane.b32.xlu1 %v771_v3, %s898_s12  ;;  %762 = vrot.lane.b32.xlu0 %v771_v3, %s899_s14 }
  0x3f   : > { %v1074_v14 = vadd.s32 4294967295, %v257_v12  ;;  %v1076_v15 = vadd.s32 1, %v257_v12  ;;  %vm283_vm1 = vcmp.ge.s32.totalorder %v1072_v13, 0  ;;  %vm316_vm10 = vcmp.lt.s32.totalorder %v1080_v18, 16 }
  0x41   : > { %vm284_vm3 = vcmp.ge.s32.totalorder %v1074_v14, 0  ;;  %vm317_vm6 = vcmp.lt.s32.totalorder %v1076_v15, 16 }
  0x42   : > { %777 = vrot.lane.b32.xlu1 %v771_v3, %s900_s16  ;;  %767 = vrot.lane.b32.xlu0 %v771_v3, %s901_s29  ;;  %s696_s16 = sshll.u32 %s960_s22, 7  ;;  %s240_s29 = scalar_lea.vmem [#allocation5], %s684_s17 }
  0x43   : > { %s908_s22 = smov [#allocation5]  }
  0x44   : > { %s833_s17 = sshll.u32 %s908_s22, 4  ;;  %s834_s17 = int_to_ptr.vmem [resolvable:$false] %s833_s17 }
  0x45   : > { %s835_s10 = scalar_lea.vmem %s834_s17, 256 }
  0x46   : > { %782 = vrot.lane.b32.xlu0 %v781_v4, %s902_s25  ;;  %787 = vrot.lane.b32.xlu1 %v781_v4, %s903_s26  ;;  %s607_s25 = sshll.u32 %s240_s29, 4  ;;  %s1154_s25 = int_to_ptr.vmem [resolvable:$true] %s607_s25 }
  0x47   : > { %s829_s9 = scalar_lea.vmem %s1154_s25, 128  ;;  %p836_p7 = scmp.lt.s32.totalorder %s1154_s25, %s834_s17 }
  0x48   : > { %p830_p6 = scmp.ne.s32.totalorder %s1154_s25, %s829_s9  ;;  %p837_p10 = scmp.lt.s32.totalorder %s835_s10, %s829_s9 }
  0x4a   : > { %792 = vrot.lane.b32.xlu0 %v781_v4, %s904_s28  ;;  %369 = vrot.lane.b32.xlu1 %v1061_v2, %s905_s8  ;;  %p831_p12 = pnand %p830_p6, %p1210_p11  ;;  %p838_p2 = por %p837_p10, %p836_p7 }
  0x4c   : > { %p832_p13 = pneg %p831_p12 }
  0x4e   : > { %367 = vrot.lane.b32.xlu0 %v1057_v1, %s905_s8  ;;  %414 = vperm.xlu1 %796, %v411_v6   ;;  %s1152_s8 = scalar_lea.hbm %s1201_s5, %s696_s16  ;;  %p839_p4 = pnand %p838_p2, %p832_p13 }
  0xb0   : > { %v773_v16 = vpop.permute.xlu1 %772  ;;  %v763_v17 = vpop.permute.xlu0 %762 }
  0xb1   : > { %v775_v19 = vunpack.i.h.bf16 %v773_v16  ;;  %v774_v20 = vunpack.i.l.bf16 %v773_v16  ;;  %v765_v21 = vunpack.i.h.bf16 %v763_v17  ;;  %v764_v22 = vunpack.i.l.bf16 %v763_v17 }
  0xb3   : > { %v331_v23 = vsel %vm330_vm2, %v764_v22, %v765_v21  ;;  %v334_v24 = vsel %vm330_vm2, 0.0, %v764_v22  ;;  %v277_v25 = vsel %vm276_vm0, %v774_v20, %v775_v19  ;;  %v280_v33 = vsel %vm276_vm0, 0.0, %v774_v20 }
  0xb4   : > { %v335_v26 = vsel %vm283_vm1, %v334_v24, 0.0  ;;  %v778_v27 = vpop.permute.xlu1 %777  ;;  %v768_v28 = vpop.permute.xlu0 %767  ;;  %v336_v29 = vsel %vm284_vm3, %v331_v23, 0.0  ;;  %v294_v35 = vsel %vm284_vm3, %v277_v25, 0.0  ;;  %v293_v53 = vsel %vm283_vm1, %v280_v33, 0.0 }
  0xb5   : > { %v780_v30 = vunpack.i.h.bf16 %v778_v27  ;;  %v779_v31 = vunpack.i.l.bf16 %v778_v27  ;;  %v770_v32 = vunpack.i.h.bf16 %v768_v28  ;;  %v769_v34 = vunpack.i.l.bf16 %v768_v28 }
  0xb6   : > { %v385_v36 = vrot.slane %v335_v26, 4  ;;  %v386_v39 = vrot.slane %v336_v29, 4 }
  0xb7   : > { %v311_v37 = vsel %vm307_vm4, 0.0, %v779_v31  ;;  %v308_v38 = vsel %vm307_vm4, %v779_v31, %v780_v30  ;;  %v302_v40 = vsel %vm299_vm5, 0.0, %v769_v34  ;;  %v300_v43 = vsel %vm299_vm5, %v769_v34, %v770_v32  ;;  %v500_v34 = vld [vmem:[%s1199_s3] sm:$0xf] }
  0xb8   : > { %v783_v41 = vpop.permute.xlu0 %782  ;;  %v788_v42 = vpop.permute.xlu1 %787  ;;  %v325_v44 = vsel %vm317_vm6, %v308_v38, 0.0  ;;  %v324_v45 = vsel %vm316_vm10, %v311_v37, 0.0  ;;  %v379_v46 = vrot.slane %v302_v40, 4  ;;  %v380_v51 = vrot.slane %v300_v43, 4 }
  0xb9   : > { %v785_v47 = vunpack.i.h.bf16 %v783_v41  ;;  %v784_v48 = vunpack.i.l.bf16 %v783_v41  ;;  %v790_v49 = vunpack.i.h.bf16 %v788_v42  ;;  %v789_v50 = vunpack.i.l.bf16 %v788_v42 }
  0xba   : > { %v405_v52 = vsel %vm401_vm8, %v325_v44, %v386_v39  ;;  %v402_v56 = vsel %vm401_vm8, %v293_v53, %v379_v46  ;;  %v404_v57 = vsel %vm401_vm8, %v324_v45, %v385_v36  ;;  %v403_v62 = vsel %vm401_vm8, %v294_v35, %v380_v51 }
  0xbb   : > { %v342_v54 = vsel %vm341_vm7, %v785_v47, %v784_v48  ;;  %v345_v55 = vsel %vm341_vm7, %v784_v48, 0.0  ;;  %v364_v59 = vsel %vm363_vm9, %v790_v49, %v789_v50  ;;  %v366_v60 = vsel %vm363_vm9, %v789_v50, 0.0 }
  0xbc   : > { %v347_v58 = vsel %vm317_vm6, %v345_v55, 0.0  ;;  %v793_v61 = vpop.permute.xlu0 %792  ;;  %v397_v3 = vrot.slane %v364_v59, 4  ;;  %v398_v4 = vrot.slane %v366_v60, 4  ;;  %v697_v7 = vpack.c.bf16 %v405_v52, %v403_v62  ;;  %v370_v10 = vpop.permute.xlu1 %369 }
  0xbd   : > { %v393_v63 = vrot.slane %v347_v58, 4  ;;  %v795_v5 = vunpack.i.h.bf16 %v793_v61  ;;  %v794_v6 = vunpack.i.l.bf16 %v793_v61  ;;  %v346_v8 = vsel %vm316_vm10, %v342_v54, 0.0 }
  0xbe   : > { %v699_v9 = vpack.c.bf16 %v404_v57, %v402_v56  ;;  %v392_v11 = vrot.slane %v346_v8, 4  ;;  %698 = vmatprep.subr.bf16.mxu0 %v697_v7  ;;  %v375_v19 = vsel %vm371_vm12, %v370_v10, 0.0  ;;  %v583_v37 = vcombine.high %v1054_v0, %v1054_v0 }
  0xbf   : > { %v353_v12 = vsel %vm352_vm11, %v795_v5, %v794_v6  ;;  %v356_v16 = vsel %vm352_vm11, %v794_v6, 0.0  ;;  %v407_v22 = vsel %vm401_vm8, %v1061_v2, %v393_v63  ;;  %v377_v27 = vsel %vm317_vm6, %v375_v19, 0.0  ;;  %v501_v2 = vld [vmem:[%s1200_s4] sm:$0xf] }
  0xc0   : > { %v358_v17 = vsel %vm284_vm3, %v356_v16, 0.0  ;;  %700 = vmatpush1.bf16.msra.mxu0 %v699_v9  ;;  %v368_v20 = vpop.permute.xlu0 %367  ;;  %v357_v21 = vsel %vm283_vm1, %v353_v12, 0.0  ;;  %v406_v24 = vsel %vm401_vm8, %v1057_v1, %v392_v11  ;;  %v410_v1 = vld [vmem:[%s1197_s1] sm:$0xff]  ;;  %504 = vperm.xlu0 %797, %v501_v2  }
  0xc1   : > { %v409_v23 = vsel %vm401_vm8, %v358_v17, %v398_v4  ;;  %v408_v25 = vsel %vm401_vm8, %v357_v21, %v397_v3  ;;  %v372_v28 = vsel %vm371_vm12, %v368_v20, %v370_v10 }
  0xc2   : > { %v701_v26 = vpack.c.bf16 %v409_v23, %v407_v22  ;;  %v703_v14 = vpack.c.bf16 %v408_v25, %v406_v24  ;;  %v376_v13 = vsel %vm316_vm10, %v372_v28, 0.0 }
  0xc4   : > { %702 = vmatprep.subr.bf16.mxu0 %v701_v26 }
  0xc5   : > { %704 = vmatpush1.bf16.msra.mxu0 %v703_v14 }
  0xc6   : > { %686 = vmatprep.subr.msk.mxu0 %vm401_vm8, %v377_v27 }
  0xc9   : > { %687 = vmatpush1.msk.msra.mxu0 %vm401_vm8, %v376_v13 }
  0xca   : > { %688 = vmatmul.mubr.msk.f32.vlgmr.msra.gmra.mrb[0].mxu0 %vm417_vm13, %v410_v1 }
  0xcd   : > { %v415_v15 = vpop.permute.xlu1 %414 }
 0x13f   : > { %v505_v35 = vpop.permute.xlu0 %504 }
 0x19d   : > { %v493_v29 = vpop.f32.mrb[0].mxu0 }
 0x19e   : > { %v494_v30 = vadd.f32 %v493_v29, %v415_v15  ;;  %v495_v18 = vpop.f32.mrb[1].mxu0 }
 0x19f   : > { %v496_v31 = vadd.f32 %v495_v18, %v415_v15 }
 0x1a0   : > { %v498_v33 = vmax.f32 %v494_v30, 0.0 }
 0x1a1   : > { %v499_v32 = vmax.f32 %v496_v31, 0.0 }
 0x1a3   : > { %511 = vmatprep.subr.mxu1 %v499_v32 }
 0x1a4   : > { %512 = vmatpush1.msra.mxu1 %v498_v33 }
 0x1a5   : > { %689 = vmatmul.mubr.msk.f32.vlgmr.msra.gmra.mrb[0].mxu1 %vm507_vm14, %v500_v34 }
 0x278   : > { %v577_v36 = vpop.f32.mrb[0].mxu1 }
 0x279   : > { %v578_v38 = vadd.f32 %v577_v36, %v505_v35  ;;  %v579_v39 = vpop.f32.mrb[1].mxu1 }
 0x27a   : > { %v580_v40 = vadd.f32 %v579_v39, %v505_v35 }
 0x27b   : > { %v585_v41 = vadd.f32 %v578_v38, %v1054_v0 }
 0x27c   : > { %v586_v42 = vadd.f32 %v583_v37, %v580_v40 }
 0x27e   : > { %v589_v43 = vcombine.low %v585_v41, %v586_v42 }
 0x280   : > { %591 = vst [vmem:[%s240_s29] sm:$0xff] %v589_v43 }
 0x281   : > { %842 = shalt.err (!%p839_p4)
}
 0x282   : > { %s843_s13 = scalar_lea.hbm %s1152_s8, 128  ;;  %s847_s15 = scalar_lea.hbm %s1201_s5, 256 }
 0x283   : > { %p844_p5 = scmp.ne.s32.totalorder %s1152_s8, %s843_s13  ;;  %p848_p0 = scmp.lt.u32.totalorder %s1152_s8, %s1201_s5 }
 0x284   : > { %p849_p1 = scmp.lt.u32.totalorder %s847_s15, %s843_s13  ;;  %p851_p6 = scmp.lt.u32.totalorder %s843_s13, %s1152_s8 }
 0x285   : > { %p845_p8 = pnand %p844_p5, %p1210_p11 }
 0x286   : > { %p850_p3 = por %p849_p1, %p848_p0 }
 0x287   : > { %p846_p9 = pneg %p845_p8 }
 0x288   : > { %p852_p12 = por %p851_p6, %p850_p3 }
 0x28a   : > { %p853_p13 = pnand %p852_p12, %p846_p9 }
 0x28c   : > { %856 = shalt.err (!%p853_p13)
}
 0x28d   : > { %707 = dma.vmem_to_hbm [thread:$0]  (%p1210_p11), %s1154_s25, 128, %s1152_s8, %s593_s7  }
 0x28e PF: > { %s619_s16 = sand.u32 1, %s883_s18   ;;  %p1211_p7 = scmp.ne.s32.totalorder %s1206_s6, 0 }
 0x28f   : > { %p1212_p10 = scmp.ge.s32.totalorder %s895_s21, 2  ;;  %s620_s29 = scalar_lea.sflag [#allocation4], %s619_s16 }
 0x291   : > { %p714_p2 = pnand %p1212_p10, %p1211_p7 }
 0x293   : > { %878 = dma.done.wait (!%p714_p2), %s620_s29, 128  }
 0x294   : > { %880 = vsyncadd (!%p714_p2), %s620_s29, 4294967168  ;;  %p18_p4 = scmp.ge.s32.totalorder %s964_s24, 4   ;;  %s1213_s18 = smov %s887_s19 }
 0x295   : > { %s1214_s19 = smov %s891_s20  ;;  %s1215_s20 = smov %s976_s27 }
 0x296   : > { %s1216_s21 = smov %s964_s24  ;;  %20 = sbr.rel (!%p18_p4) target bundleno = 5 (0x5), region = 85 }
 0x29d   :  { %625 = vsyncpa [#allocation3], 1 }
 0x29e   :  { %627 = vsyncpa [#allocation3 + $0x1], 1 }
 0x29f   :  { %628 = vsyncpa [#allocation4], 1 }
 0x2a0   :  { %630 = vsyncpa [#allocation4 + $0x1], 1 }

</bundles_post_ra>
